<compile_context>
chip_gen: v5e
topology: v5e:2x2
jax: 0.10.0
libtpu: 0.0.40
codegen_flags: <defaults>
</compile_context>

<pallas_src>
import functools
import jax
import jax.numpy as jnp
from jax.experimental import pallas as pl
from jax.experimental.pallas import tpu as pltpu


def _round_up(x, m):
    return ((x + m - 1) // m) * m


# ---------------------------------------------------------------------------
# Single fused kernel: [Linear -> ReLU]*(L) -> Linear   (all BN pre-folded)
# refs = (x_ref, w0, b0, w1, b1, ..., w_{L}, b_{L}, o_ref); layer loop is
# unrolled at trace time; weights are bf16, activations/accumulation f32.
# ---------------------------------------------------------------------------
def mlp_stack_kernel(*refs, n_layers):
    x_ref, o_ref = refs[0], refs[-1]
    wb = refs[1:-1]

    h = x_ref[...]                                       # f32 activations
    for li in range(n_layers):
        w = wb[2 * li][...]                              # bf16 (Kpad, Npad)
        b = wb[2 * li + 1][...]                          # f32  (1,   Npad)
        y = jnp.dot(h.astype(w.dtype), w,
                    preferred_element_type=jnp.float32) + b
        if li < n_layers - 1:
            h = jnp.maximum(y, 0.0)                      # ReLU (BN folded away)
        else:
            o_ref[...] = y                               # output Linear


def _choose_batch_tile(B, k0pad, opad, max_width, weight_bytes):
    # >= 2 grid programs when the batch allows it: v7x has 2 TensorCores and
    # dimension_semantics=("parallel",) only shards with >= 2 programs.
    # Rows per tile must be a multiple of 8 (sublane).  Cap at 512 (v6e sweet
    # spot); shrink until a v7x-safe VMEM budget (64 MiB physical) is met.
    tb = min(512, _round_up(max((B + 1) // 2, 8), 8))
    budget = 48 * 1024 * 1024

    def vmem_need(t):
        return (2 * weight_bytes                 # double-buffered weight slabs
                + 2 * t * (k0pad + opad) * 4     # double-buffered IO tiles
                + 4 * t * max_width * 4)         # activation headroom

    while tb > 8 and vmem_need(tb) > budget:
        tb = max(8, _round_up(tb // 2, 8))
    return tb


def fused_mlp_stack(x, packed):
    """x: (B, din) float32 (unpadded). Returns (B, opad) float32."""
    B, din = x.shape
    k0pad, opad = packed["k0pad"], packed["opad"]
    ws, bs = packed["ws"], packed["bs"]
    n_layers = len(ws)

    weight_bytes = sum(int(a.size) * a.dtype.itemsize for a in ws + bs)
    max_width = max(w.shape[1] for w in ws)

    TB = _choose_batch_tile(B, k0pad, opad, max_width, weight_bytes)
    pB = _round_up(B, TB)

    # Input padded only to round_up(din, 128) -- not to the max hidden width.
    xp = jnp.zeros((pB, k0pad), jnp.float32).at[:B, :din].set(
        x.astype(jnp.float32))

    in_specs = [pl.BlockSpec((TB, k0pad), lambda i: (i, 0))]
    args = [xp]
    # Weights/biases are grid-invariant (constant index_map) and stay VMEM
    # resident across the batch grid.
    # NOTE: for models whose bf16 weight slab exceeds ~16-24 MiB, stream the
    # weights per layer from HBM (memory_space=pl.ANY + pltpu.emit_pipeline)
    # instead of keeping the whole stack resident (v7x 64 MiB VMEM).
    for w, b in zip(ws, bs):
        kp, npd = w.shape
        in_specs.append(pl.BlockSpec((kp, npd), lambda i: (0, 0)))
        in_specs.append(pl.BlockSpec((1, npd), lambda i: (0, 0)))
        args += [w, b]

    # Explicit VMEM budget; never set the scoped limit below the 32 MiB default.
    vmem_need = (2 * weight_bytes + 2 * TB * (k0pad + opad) * 4
                 + 4 * TB * max_width * 4)
    vmem_limit = max(32 * 1024 * 1024,
                     min(vmem_need * 3 // 2, 100 * 1024 * 1024))

    flops = 2 * pB * sum(w.shape[0] * w.shape[1] for w in ws)
    bytes_accessed = int(xp.size) * 4 + weight_bytes + pB * opad * 4

    out = pl.pallas_call(
        functools.partial(mlp_stack_kernel, n_layers=n_layers),
        out_shape=jax.ShapeDtypeStruct((pB, opad), jnp.float32),
        grid=(pB // TB,),
        in_specs=in_specs,
        out_specs=pl.BlockSpec((TB, opad), lambda i: (i, 0)),
        compiler_params=pltpu.CompilerParams(
            dimension_semantics=("parallel",),
            vmem_limit_bytes=vmem_limit),
        cost_estimate=pl.CostEstimate(flops=flops, transcendentals=0,
                                      bytes_accessed=bytes_accessed),
    )(*args)
    return out[:B]


# ---------------------------------------------------------------------------
# Parameter init (deterministic, mirrors the shapes in Model.__init__)
# ---------------------------------------------------------------------------
def bn_affine(gamma, beta, running_mean, running_var, eps=1e-5):
    scale = gamma / jnp.sqrt(running_var + eps)
    shift = beta - running_mean * scale
    return scale, shift


def init_params(key, embedding_size, num_numerical_cols, output_size, layers):
    params = {}
    keys = jax.random.split(key, 64)
    k = iter(keys)

    # Embedding tables ~ N(0, 1), like nn.Embedding default.
    params["embeddings"] = [
        jax.random.normal(next(k), (ni, nf), dtype=jnp.float32)
        for (ni, nf) in embedding_size
    ]

    # BatchNorm1d over numerical columns (eval-mode affine).
    g = 1.0 + 0.1 * jax.random.normal(next(k), (num_numerical_cols,), dtype=jnp.float32)
    b = 0.1 * jax.random.normal(next(k), (num_numerical_cols,), dtype=jnp.float32)
    rm = jnp.zeros((num_numerical_cols,), jnp.float32)
    rv = jnp.ones((num_numerical_cols,), jnp.float32)
    params["bn_num"] = bn_affine(g, b, rm, rv)

    num_categorical = sum(nf for _, nf in embedding_size)
    input_size = num_categorical + num_numerical_cols

    hidden = []
    for width in layers:
        bound = 1.0 / jnp.sqrt(jnp.float32(input_size))
        w = jax.random.uniform(next(k), (input_size, width),
                               minval=-bound, maxval=bound, dtype=jnp.float32)
        bias = jax.random.uniform(next(k), (width,),
                                  minval=-bound, maxval=bound, dtype=jnp.float32)
        gamma = 1.0 + 0.1 * jax.random.normal(next(k), (width,), dtype=jnp.float32)
        beta = 0.1 * jax.random.normal(next(k), (width,), dtype=jnp.float32)
        scale, shift = bn_affine(gamma, beta,
                                 jnp.zeros((width,), jnp.float32),
                                 jnp.ones((width,), jnp.float32))
        hidden.append(dict(w=w, b=bias, bn_scale=scale, bn_shift=shift))
        input_size = width
    params["hidden"] = hidden

    bound = 1.0 / jnp.sqrt(jnp.float32(layers[-1]))
    params["out_w"] = jax.random.uniform(next(k), (layers[-1], output_size),
                                         minval=-bound, maxval=bound, dtype=jnp.float32)
    params["out_b"] = jax.random.uniform(next(k), (output_size,),
                                         minval=-bound, maxval=bound, dtype=jnp.float32)
    return params


def pack_params(params, embedding_size, num_numerical_cols, output_size, layers):
    """Fold every eval-mode BN affine into the following Linear, then pad each
    layer independently to 128-aligned (Kpad, Npad) and cast weights to bf16."""
    num_emb = sum(nf for _, nf in embedding_size)
    din = num_emb + num_numerical_cols

    # Input BN (numerical columns only) as a full-width pre-affine:
    # identity over the embedding columns.
    bn_s, bn_t = params["bn_num"]
    s = jnp.concatenate([jnp.ones((num_emb,), jnp.float32), bn_s])
    t = jnp.concatenate([jnp.zeros((num_emb,), jnp.float32), bn_t])

    # Fold (x*s + t) @ W + b  ==  x @ (s[:,None]*W) + (t @ W + b), layer by layer.
    folded = []
    for layer in params["hidden"]:
        w = layer["w"] * s[:, None]
        b = layer["b"] + t @ layer["w"]
        folded.append((w, b))
        s, t = layer["bn_scale"], layer["bn_shift"]   # BN after this layer's ReLU
    w = params["out_w"] * s[:, None]
    b = params["out_b"] + t @ params["out_w"]
    folded.append((w, b))

    # Per-layer 128-aligned padding; weights -> bf16, biases stay f32.
    widths = [din] + list(layers) + [output_size]
    ws, bs = [], []
    for (w, b), kdim, ndim in zip(folded, widths[:-1], widths[1:]):
        kpad, npad = _round_up(kdim, 128), _round_up(ndim, 128)
        wp = (jnp.zeros((kpad, npad), jnp.float32)
              .at[:kdim, :ndim].set(w.astype(jnp.float32))
              .astype(jnp.bfloat16))
        bp = jnp.zeros((1, npad), jnp.float32).at[0, :ndim].set(
            b.astype(jnp.float32))
        ws.append(wp)
        bs.append(bp)

    return dict(
        embeddings=params["embeddings"],
        ws=ws, bs=bs,
        k0pad=_round_up(din, 128),
        opad=_round_up(output_size, 128),
        output_size=output_size,
        din=din,
    )


# ---------------------------------------------------------------------------
# Forward pass: embedding gather + concat is tiny glue; everything dense runs
# in one Pallas kernel.  Jit the whole thing so the glue fuses.
# ---------------------------------------------------------------------------
def model_forward(packed, x_categorical, x_numerical):
    embs = [tab[x_categorical[:, i]] for i, tab in enumerate(packed["embeddings"])]
    # embedding_dropout / per-layer Dropout: eval mode -> identity.
    # Input BatchNorm1d and all hidden BatchNorm1d are folded into the Linear
    # weights at pack time (eval-mode running stats).
    # TODO(synk): training-mode Dropout / BatchNorm batch-statistics are not
    # implemented; this reproduces eval() semantics only.
    x = jnp.concatenate(embs + [x_numerical.astype(jnp.float32)], axis=1)

    out_padded = fused_mlp_stack(x, packed)           # (B, opad), lane-dense
    return out_padded[:, :packed["output_size"]]      # (B, output_size)


if __name__ == "__main__":
    # Small shapes consistent with the module:
    embedding_size = [(10, 4), (8, 3), (6, 2)]   # 3 categorical cols, emb dim 9
    num_numerical_cols = 5
    output_size = 2
    layers = [32, 16]
    batch = 8

    key = jax.random.PRNGKey(0)
    kp, kc, kn = jax.random.split(key, 3)

    params = init_params(kp, embedding_size, num_numerical_cols, output_size, layers)
    packed = pack_params(params, embedding_size, num_numerical_cols,
                         output_size, layers)

    x_categorical = jnp.stack(
        [jax.random.randint(jax.random.fold_in(kc, i), (batch,), 0, ni)
         for i, (ni, _) in enumerate(embedding_size)], axis=1).astype(jnp.int32)
    x_numerical = jax.random.normal(kn, (batch, num_numerical_cols), dtype=jnp.float32)

    fwd = jax.jit(functools.partial(model_forward, packed))
    out = jax.block_until_ready(fwd(x_categorical, x_numerical))
    assert out.shape == (batch, output_size)
    assert bool(jnp.all(jnp.isfinite(out)))
    print("KERNEL_OK")
</pallas_src>

<mosaic_0001>
module attributes {stable_mosaic.version = 11 : i64} {
  func.func @mlp_stack_kernel(%arg0: i32, %arg1: memref<8x128xf32, #tpu.memory_space<vmem>>, %arg2: memref<128x128xbf16, #tpu.memory_space<vmem>>, %arg3: memref<1x128xf32, #tpu.memory_space<vmem>>, %arg4: memref<128x128xbf16, #tpu.memory_space<vmem>>, %arg5: memref<1x128xf32, #tpu.memory_space<vmem>>, %arg6: memref<128x128xbf16, #tpu.memory_space<vmem>>, %arg7: memref<1x128xf32, #tpu.memory_space<vmem>>, %arg8: memref<8x128xf32, #tpu.memory_space<vmem>>) attributes {dimension_semantics = [#tpu.dimension_semantics<parallel>], iteration_bounds = array<i64: 1>, scalar_prefetch = 0 : i64, scratch_operands = 0 : i64, tpu.core_type = #tpu.core_type<tc>, window_params = [{transform_indices = @transform_0, window_bounds = array<i64: 8, 128>}, {pipeline_mode = #tpu.pipeline_mode<synchronous>, transform_indices = @transform_1, window_bounds = array<i64: 128, 128>}, {pipeline_mode = #tpu.pipeline_mode<synchronous>, transform_indices = @transform_2, window_bounds = array<i64: 1, 128>}, {pipeline_mode = #tpu.pipeline_mode<synchronous>, transform_indices = @transform_3, window_bounds = array<i64: 128, 128>}, {pipeline_mode = #tpu.pipeline_mode<synchronous>, transform_indices = @transform_4, window_bounds = array<i64: 1, 128>}, {pipeline_mode = #tpu.pipeline_mode<synchronous>, transform_indices = @transform_5, window_bounds = array<i64: 128, 128>}, {pipeline_mode = #tpu.pipeline_mode<synchronous>, transform_indices = @transform_6, window_bounds = array<i64: 1, 128>}, {transform_indices = @transform_7, window_bounds = array<i64: 8, 128>}]} {
    %c0 = arith.constant 0 : index
    %c0_0 = arith.constant 0 : index
    %0 = vector.load %arg1[%c0, %c0_0] : memref<8x128xf32, #tpu.memory_space<vmem>>, vector<8x128xf32>
    %c0_1 = arith.constant 0 : index
    %c0_2 = arith.constant 0 : index
    %1 = vector.load %arg2[%c0_1, %c0_2] : memref<128x128xbf16, #tpu.memory_space<vmem>>, vector<128x128xbf16>
    %c0_3 = arith.constant 0 : index
    %c0_4 = arith.constant 0 : index
    %2 = vector.load %arg3[%c0_3, %c0_4] : memref<1x128xf32, #tpu.memory_space<vmem>>, vector<1x128xf32>
    %3 = arith.truncf %0 : vector<8x128xf32> to vector<8x128xbf16>
    %cst = arith.constant dense<0.000000e+00> : vector<8x128xf32>
    %4 = tpu.matmul %3, %1, %cst {dimension_numbers = #tpu.dot_dimension_numbers<[1], [0], [0], [1], [0, 0, 1, 1], [], []>} : vector<8x128xbf16>, vector<128x128xbf16>, vector<8x128xf32> -> vector<8x128xf32>
    %5 = vector.broadcast %2 : vector<1x128xf32> to vector<8x128xf32>
    %6 = arith.addf %4, %5 : vector<8x128xf32>
    %cst_5 = arith.constant 0.000000e+00 : f32
    %7 = vector.broadcast %cst_5 : f32 to vector<8x128xf32>
    %8 = arith.maximumf %6, %7 : vector<8x128xf32>
    %c0_6 = arith.constant 0 : index
    %c0_7 = arith.constant 0 : index
    %9 = vector.load %arg4[%c0_6, %c0_7] : memref<128x128xbf16, #tpu.memory_space<vmem>>, vector<128x128xbf16>
    %c0_8 = arith.constant 0 : index
    %c0_9 = arith.constant 0 : index
    %10 = vector.load %arg5[%c0_8, %c0_9] : memref<1x128xf32, #tpu.memory_space<vmem>>, vector<1x128xf32>
    %11 = arith.truncf %8 : vector<8x128xf32> to vector<8x128xbf16>
    %cst_10 = arith.constant dense<0.000000e+00> : vector<8x128xf32>
    %12 = tpu.matmul %11, %9, %cst_10 {dimension_numbers = #tpu.dot_dimension_numbers<[1], [0], [0], [1], [0, 0, 1, 1], [], []>} : vector<8x128xbf16>, vector<128x128xbf16>, vector<8x128xf32> -> vector<8x128xf32>
    %13 = vector.broadcast %10 : vector<1x128xf32> to vector<8x128xf32>
    %14 = arith.addf %12, %13 : vector<8x128xf32>
    %cst_11 = arith.constant 0.000000e+00 : f32
    %15 = vector.broadcast %cst_11 : f32 to vector<8x128xf32>
    %16 = arith.maximumf %14, %15 : vector<8x128xf32>
    %c0_12 = arith.constant 0 : index
    %c0_13 = arith.constant 0 : index
    %17 = vector.load %arg6[%c0_12, %c0_13] : memref<128x128xbf16, #tpu.memory_space<vmem>>, vector<128x128xbf16>
    %c0_14 = arith.constant 0 : index
    %c0_15 = arith.constant 0 : index
    %18 = vector.load %arg7[%c0_14, %c0_15] : memref<1x128xf32, #tpu.memory_space<vmem>>, vector<1x128xf32>
    %19 = arith.truncf %16 : vector<8x128xf32> to vector<8x128xbf16>
    %cst_16 = arith.constant dense<0.000000e+00> : vector<8x128xf32>
    %20 = tpu.matmul %19, %17, %cst_16 {dimension_numbers = #tpu.dot_dimension_numbers<[1], [0], [0], [1], [0, 0, 1, 1], [], []>} : vector<8x128xbf16>, vector<128x128xbf16>, vector<8x128xf32> -> vector<8x128xf32>
    %21 = vector.broadcast %18 : vector<1x128xf32> to vector<8x128xf32>
    %22 = arith.addf %20, %21 : vector<8x128xf32>
    %c0_17 = arith.constant 0 : index
    %c0_18 = arith.constant 0 : index
    %23 = vector.load %arg8[%c0_17, %c0_18] : memref<8x128xf32, #tpu.memory_space<vmem>>, vector<8x128xf32>
    tpu.vector_store %arg8[%c0_17, %c0_18], %22 {strides = array<i32>} : memref<8x128xf32, #tpu.memory_space<vmem>>, vector<8x128xf32>,
    return
  }
  func.func @transform_0(%arg0: i32) -> (i32, i32) {
    %c0_i32 = arith.constant 0 : i32
    %c0_i32_0 = arith.constant 0 : i32
    return %arg0, %c0_i32 : i32, i32
  }
  func.func @transform_1(%arg0: i32) -> (i32, i32) {
    %c0_i32 = arith.constant 0 : i32
    %c0_i32_0 = arith.constant 0 : i32
    %c0_i32_1 = arith.constant 0 : i32
    return %c0_i32, %c0_i32_0 : i32, i32
  }
  func.func @transform_2(%arg0: i32) -> (i32, i32) {
    %c0_i32 = arith.constant 0 : i32
    %c0_i32_0 = arith.constant 0 : i32
    %c0_i32_1 = arith.constant 0 : i32
    return %c0_i32, %c0_i32_0 : i32, i32
  }
  func.func @transform_3(%arg0: i32) -> (i32, i32) {
    %c0_i32 = arith.constant 0 : i32
    %c0_i32_0 = arith.constant 0 : i32
    %c0_i32_1 = arith.constant 0 : i32
    return %c0_i32, %c0_i32_0 : i32, i32
  }
  func.func @transform_4(%arg0: i32) -> (i32, i32) {
    %c0_i32 = arith.constant 0 : i32
    %c0_i32_0 = arith.constant 0 : i32
    %c0_i32_1 = arith.constant 0 : i32
    return %c0_i32, %c0_i32_0 : i32, i32
  }
  func.func @transform_5(%arg0: i32) -> (i32, i32) {
    %c0_i32 = arith.constant 0 : i32
    %c0_i32_0 = arith.constant 0 : i32
    %c0_i32_1 = arith.constant 0 : i32
    return %c0_i32, %c0_i32_0 : i32, i32
  }
  func.func @transform_6(%arg0: i32) -> (i32, i32) {
    %c0_i32 = arith.constant 0 : i32
    %c0_i32_0 = arith.constant 0 : i32
    %c0_i32_1 = arith.constant 0 : i32
    return %c0_i32, %c0_i32_0 : i32, i32
  }
  func.func @transform_7(%arg0: i32) -> (i32, i32) {
    %c0_i32 = arith.constant 0 : i32
    %c0_i32_0 = arith.constant 0 : i32
    return %arg0, %c0_i32 : i32, i32
  }
}

</mosaic_0001>

<bundles_post_ra>
// kernel: model_forward.1
= control target key start
LH: loop header
LB: loop body
LE: loop exit
PB: predicated region body
PF: predicated region fallthrough
CT: control target
= control target key end

     0   :  { %s530_s1 = inlined_call_operand.vmem [shape: bf16[128,128], index: 1, kind: input, shape index: {}]   ;;  %s531_s3 = inlined_call_operand.vmem [shape: bf16[128,128], index: 3, kind: input, shape index: {}]   ;;  %s532_s2 = inlined_call_operand.vmem [shape: f32[1,128], index: 2, kind: input, shape index: {}]   ;;  %s533_s0 = inlined_call_operand.vmem [shape: f32[8,128], index: 0, kind: input, shape index: {}]   ;;  %s534_s4 = inlined_call_operand.vmem [shape: f32[1,128], index: 4, kind: input, shape index: {}]   ;;  %s535_s5 = inlined_call_operand.vmem [shape: bf16[128,128], index: 5, kind: input, shape index: {}]   ;;  %s536_s6 = inlined_call_operand.vmem [shape: f32[1,128], index: 6, kind: input, shape index: {}]   ;;  %s537_s7 = inlined_call_operand.vmem [shape: f32[8,128], index: 7, kind: output, shape index: {}]  }
   0x1   :  { %v383_v0 = vld [vmem:[%s530_s1 + $0x38] sm:$0xff]  ;;  %v382_v1 = vld [vmem:[%s530_s1 + $0x30] sm:$0xff]  ;;  %v381_v4 = vld [vmem:[%s530_s1 + $0x28] sm:$0xff] }
   0x2   :  { %96 = vmatpush.bf16.msra.mxu0 %v383_v0  ;;  %v391_v2 = vld [vmem:[%s531_s3 + $0x38] sm:$0xff]  ;;  %v390_v3 = vld [vmem:[%s531_s3 + $0x30] sm:$0xff]  ;;  %v389_v5 = vld [vmem:[%s531_s3 + $0x28] sm:$0xff] }
   0x3   :  { %179 = vmatpush.bf16.msra.mxu1 %v391_v2  ;;  %v380_v6 = vld [vmem:[%s530_s1 + $0x20] sm:$0xff]  ;;  %v379_v8 = vld [vmem:[%s530_s1 + $0x18] sm:$0xff]  ;;  %v378_v10 = vld [vmem:[%s530_s1 + $0x10] sm:$0xff] }
   0x4   :  { %v388_v7 = vld [vmem:[%s531_s3 + $0x20] sm:$0xff]  ;;  %v387_v9 = vld [vmem:[%s531_s3 + $0x18] sm:$0xff]  ;;  %v386_v11 = vld [vmem:[%s531_s3 + $0x10] sm:$0xff] }
   0x5   :  { %v377_v12 = vld [vmem:[%s530_s1 + $0x8] sm:$0xff]  ;;  %v376_v13 = vld [vmem:[%s530_s1] sm:$0xff]  ;;  %v399_v18 = vld [vmem:[%s535_s5 + $0x38] sm:$0xff] }
   0x6   :  { %97 = vmatpush.bf16.msra.mxu0 %v382_v1  ;;  %v26_v14 = vld [vmem:[%s533_s0] sm:$0xff]  ;;  %v385_v16 = vld [vmem:[%s531_s3 + $0x8] sm:$0xff]  ;;  %262 = vmatpush.bf16.msra.mxu2 %v399_v18  ;;  %v398_v19 = vld [vmem:[%s535_s5 + $0x30] sm:$0xff] }
   0x7   :  { %180 = vmatpush.bf16.msra.mxu1 %v390_v3  ;;  %v44_v15 = vpack.c.bf16 %v26_v14, %v26_v14  ;;  %v384_v17 = vld [vmem:[%s531_s3] sm:$0xff]  ;;  %v397_v20 = vld [vmem:[%s535_s5 + $0x28] sm:$0xff]  ;;  %v395_v22 = vld [vmem:[%s535_s5 + $0x18] sm:$0xff] }
   0x8   :  { %v396_v21 = vld [vmem:[%s535_s5 + $0x20] sm:$0xff]  ;;  %v394_v23 = vld [vmem:[%s535_s5 + $0x10] sm:$0xff]  ;;  %v393_v30 = vld [vmem:[%s535_s5 + $0x8] sm:$0xff] }
   0x9   :  { %v400_v24 = vld [vmem:[%s532_s2] ss:$0 sm:$0xff] }
   0xa   :  { %98 = vmatpush.bf16.msra.mxu0 %v381_v4  ;;  %263 = vmatpush.bf16.msra.mxu2 %v398_v19  ;;  %v392_v31 = vld [vmem:[%s535_s5] sm:$0xff] }
   0xb   :  { %181 = vmatpush.bf16.msra.mxu1 %v389_v5  ;;  %v401_v32 = vld [vmem:[%s534_s4] ss:$0 sm:$0xff] }
   0xc   :  { %v402_v38 = vld [vmem:[%s536_s6] ss:$0 sm:$0xff] }
   0xe   :  { %99 = vmatpush.bf16.msra.mxu0 %v380_v6  ;;  %264 = vmatpush.bf16.msra.mxu2 %v397_v20 }
   0xf   :  { %182 = vmatpush.bf16.msra.mxu1 %v388_v7 }
  0x12   :  { %100 = vmatpush.bf16.msra.mxu0 %v379_v8  ;;  %265 = vmatpush.bf16.msra.mxu2 %v396_v21 }
  0x13   :  { %183 = vmatpush.bf16.msra.mxu1 %v387_v9 }
  0x16   :  { %101 = vmatpush.bf16.msra.mxu0 %v378_v10  ;;  %266 = vmatpush.bf16.msra.mxu2 %v395_v22 }
  0x17   :  { %184 = vmatpush.bf16.msra.mxu1 %v386_v11 }
  0x1a   :  { %102 = vmatpush.bf16.msra.mxu0 %v377_v12  ;;  %267 = vmatpush.bf16.msra.mxu2 %v394_v23 }
  0x1b   :  { %185 = vmatpush.bf16.msra.mxu1 %v385_v16 }
  0x1e   :  { %103 = vmatpush.bf16.msra.mxu0 %v376_v13  ;;  %268 = vmatpush.bf16.msra.mxu2 %v393_v30 }
  0x1f   :  { %186 = vmatpush.bf16.msra.mxu1 %v384_v17 }
  0x21   :  { %104 = vmatmul.bf16.vlgmr.msra.gmra.mxu0 %v44_v15 }
  0x22   :  { %269 = vmatpush.bf16.msra.mxu2 %v392_v31 }
  0x9e   :  { %v105_v25 = vpop.f32.mrf.mxu0 }
  0x9f   :  { %v106_v26 = vadd.f32 %v400_v24, %v105_v25 }
  0xa1   :  { %v109_v27 = vmax.f32 %v106_v26, 0.0 }
  0xa3   :  { %v127_v28 = vpack.c.bf16 %v109_v27, %v109_v27 }
  0xa5   :  { %187 = vmatmul.bf16.vlgmr.msra.gmra.mxu1 %v127_v28 }
  0xa6   :  { %v107_v29 = vpop.f32.mrf.mxu0 }
 0x122   :  { %v188_v33 = vpop.f32.mrf.mxu1 }
 0x123   :  { %v189_v34 = vadd.f32 %v401_v32, %v188_v33 }
 0x125   :  { %v192_v35 = vmax.f32 %v189_v34, 0.0 }
 0x127   :  { %v210_v36 = vpack.c.bf16 %v192_v35, %v192_v35 }
 0x129   :  { %270 = vmatmul.bf16.vlgmr.msra.gmra.mxu2 %v210_v36 }
 0x12a   :  { %v190_v37 = vpop.f32.mrf.mxu1 }
 0x1ac   :  { %v271_v39 = vpop.f32.mrf.mxu2 }
 0x1ad   :  { %v272_v40 = vadd.f32 %v402_v38, %v271_v39 }
 0x1af   :  { %275 = vst [vmem:[%s537_s7] sm:$0xff] %v272_v40 }
 0x1b4   :  { %v273_v41 = vpop.f32.mrf.mxu2 }

</bundles_post_ra>
